<compile_context>
chip_gen: v5e
topology: v5e:2x2
jax: 0.10.0
libtpu: 0.0.40
codegen_flags: <defaults>
</compile_context>

<pallas_src>
import jax
import jax.numpy as jnp
from jax.experimental import pallas as pl
from jax.experimental.pallas import tpu as pltpu

TM = 16384          # max batch-lanes per grid step
_SPLIT_MIN = 2048   # below this many lanes, one tile (splitting buys nothing)


def _round_up(n: int, m: int) -> int:
    return ((n + m - 1) // m) * m


def _cdiv(a: int, b: int) -> int:
    return -(-a // b)


def _tiling(n_lanes: int):
    """(tile_lanes, num_steps) for the 1-D batch grid; n_lanes is a multiple of 128."""
    if n_lanes <= _SPLIT_MIN:
        return n_lanes, 1
    # >=2 balanced steps: v7x's dual TensorCores can shard the "parallel" axis,
    # and each tile stays <= TM so VMEM is bounded on every generation.
    steps = max(2, _cdiv(n_lanes, TM))
    tile = _round_up(_cdiv(n_lanes, steps), 128)   # <= TM, lane-aligned
    return tile, steps


def mlp_kernel(x_ref, w1_ref, b1_ref, w2_ref, b2_ref, w3c_ref, b3_ref, out_ref):
    x = x_ref[...]                                   # (2, tile) f32, batch on lanes

    # Layer 1 (in_features=2): exact-f32 VPU broadcast-FMAs.
    w1 = w1_ref[...]                                 # (20, 2) f32
    h1 = w1[:, 0:1] * x[0:1, :] + w1[:, 1:2] * x[1:2, :] + b1_ref[...]
    h1 = jnp.maximum(h1, 0.0)                        # (20, tile) f32

    # Layer 2: (20,20)@(20,tile) on the MXU, bf16 operands, f32 accumulation.
    h2 = jnp.dot(w2_ref[...], h1.astype(jnp.bfloat16),
                 preferred_element_type=jnp.float32) + b2_ref[...]
    h2 = jnp.maximum(h2, 0.0)                        # (20, tile) f32

    # Layer 3 (out_features=1): keep it OFF the MXU — a w3-weighted sublane
    # reduction on the VPU/XLU (overlaps with the MXU work of other tiles).
    h3 = jnp.sum(w3c_ref[...] * h2, axis=0, keepdims=True) + b3_ref[...]
    out_ref[...] = h3.astype(out_ref.dtype)          # (1, tile) lane-dense


def _forward_feature_major_padded(x_t, p, tile, steps):
    """x_t: (2, tile*steps) f32 (zero-padded columns). Returns (1, tile*steps)."""
    const = lambda a: pl.BlockSpec(a.shape, lambda i: (0, 0))   # VMEM-resident
    return pl.pallas_call(
        mlp_kernel,
        out_shape=jax.ShapeDtypeStruct((1, tile * steps), jnp.float32),
        grid=(steps,),
        in_specs=[
            pl.BlockSpec((2, tile), lambda i: (0, i)),          # x tile (lanes=batch)
            const(p["w1"]), const(p["b1"]),
            const(p["w2"]), const(p["b2"]),
            const(p["w3c"]), const(p["b3"]),
        ],
        out_specs=pl.BlockSpec((1, tile), lambda i: (0, i)),
        compiler_params=pltpu.CompilerParams(
            dimension_semantics=("parallel",),      # sharded across v7x's 2 TCs
            vmem_limit_bytes=32 * 1024 * 1024,      # headroom for TM sweeps (v5e default is 16 MiB)
        ),
    )(x_t, p["w1"], p["b1"], p["w2"], p["b2"], p["w3c"], p["b3"])


@jax.jit
def circle_model_v2(x, p):
    """x: (N, 2) (PyTorch layout). p: prepare_params output. Returns (N, 1) f32."""
    n = x.shape[0]
    tile, steps = _tiling(_round_up(max(n, 1), 128))
    n_pad = tile * steps
    # Single fused transpose+pad (no zeros-then-overwrite scatter).
    # TODO(synk): producers that already hold feature-major (2, N) data should
    # call circle_model_v2_feature_major and skip this HBM round trip entirely.
    x_t = jnp.pad(x.astype(jnp.float32).T, ((0, 0), (0, n_pad - n)))
    out_t = _forward_feature_major_padded(x_t, p, tile, steps)
    return out_t[0, :n].reshape(n, 1)


@jax.jit
def circle_model_v2_feature_major(x_t, p):
    """Fast path for producers with feature-major data. x_t: (2, N) f32 -> (1, N)."""
    n = x_t.shape[1]
    tile, steps = _tiling(_round_up(max(n, 1), 128))
    x_pad = jnp.pad(x_t.astype(jnp.float32), ((0, 0), (0, tile * steps - n)))
    return _forward_feature_major_padded(x_pad, p, tile, steps)[:, :n]


def prepare_params(params):
    """One-time layout prep (hoisted out of the per-call path).

    PyTorch weights are (out, in); the kernel computes W @ x_t, so w1/w2 are
    used as-is (w2 pre-cast to bf16 for the MXU), w3 becomes a (20,1) column
    for the VPU reduction, and biases become column vectors.
    """
    f32 = jnp.float32
    return {
        "w1": jnp.asarray(params["w1"], f32),                       # (20, 2)
        "b1": jnp.asarray(params["b1"], f32).reshape(-1, 1),        # (20, 1)
        "w2": jnp.asarray(params["w2"], jnp.bfloat16),              # (20, 20) MXU operand
        "b2": jnp.asarray(params["b2"], f32).reshape(-1, 1),        # (20, 1)
        "w3c": jnp.asarray(params["w3"], f32).reshape(-1, 1),       # (20, 1)  (= w3.T)
        "b3": jnp.asarray(params["b3"], f32).reshape(1, 1),         # (1, 1)
    }


def init_params(key):
    """Deterministic init matching nn.Linear shapes (weight: (out,in), bias: (out,))."""
    ks = jax.random.split(key, 6)

    def u(k, shape, fan_in):
        bound = 1.0 / jnp.sqrt(fan_in)
        return jax.random.uniform(k, shape, jnp.float32, -bound, bound)

    return {
        "w1": u(ks[0], (20, 2), 2.0),   "b1": u(ks[1], (20,), 2.0),
        "w2": u(ks[2], (20, 20), 20.0), "b2": u(ks[3], (20,), 20.0),
        "w3": u(ks[4], (1, 20), 20.0),  "b3": u(ks[5], (1,), 20.0),
    }


def _reference(x, params, *, layer2_bf16):
    """PyTorch-faithful forward. layer2_bf16=True mirrors the kernel's numerics
    (bf16 MXU operands on layer 2, f32 everywhere else); False is strict f32."""
    hi = jax.lax.Precision.HIGHEST
    h1 = jnp.maximum(jnp.dot(x, params["w1"].T, precision=hi) + params["b1"], 0.0)
    if layer2_bf16:
        z2 = jnp.dot(h1.astype(jnp.bfloat16), params["w2"].T.astype(jnp.bfloat16),
                     preferred_element_type=jnp.float32)
    else:
        z2 = jnp.dot(h1, params["w2"].T, precision=hi)
    h2 = jnp.maximum(z2 + params["b2"], 0.0)
    return jnp.dot(h2, params["w3"].T, precision=hi) + params["b3"]


if __name__ == "__main__":
    key = jax.random.PRNGKey(0)
    k_param, k1, k2, k3 = jax.random.split(key, 4)
    params = init_params(k_param)
    prepared = prepare_params(params)   # one-time layout prep, not per call

    cases = (
        ("tiny", k1, 8),          # single tile
        ("ragged", k2, 300),      # N not a multiple of 128
        ("multi-tile", k3, 2500), # 2 balanced grid steps + intra-tile padding
    )
    for name, k, n in cases:
        x = jax.random.normal(k, (n, 2), dtype=jnp.float32)
        out = jax.block_until_ready(circle_model_v2(x, prepared))
        assert out.shape == (n, 1), f"bad shape ({name})"

        # Tight check against a reference that uses the kernel's numerics
        # (bf16 MXU operands on layer 2, exact f32 elsewhere).
        ref_mx = _reference(x, params, layer2_bf16=True)
        assert jnp.allclose(out, ref_mx, atol=1e-3, rtol=1e-3), f"mismatch vs MXU-numerics ref ({name})"

        # Looser check against the strict-float32 module forward: the only
        # difference is bf16 rounding of the layer-2 MXU operands (standard
        # TPU matmul practice).
        ref_f32 = _reference(x, params, layer2_bf16=False)
        assert jnp.allclose(out, ref_f32, atol=2e-2, rtol=2e-2), f"mismatch vs f32 ref ({name})"

    print("KERNEL_OK")
</pallas_src>

<mosaic_0001>
module attributes {stable_mosaic.version = 11 : i64} {
  func.func @mlp_kernel(%arg0: i32, %arg1: memref<2x128xf32, #tpu.memory_space<vmem>>, %arg2: memref<20x2xf32, #tpu.memory_space<vmem>>, %arg3: memref<20x1xf32, #tpu.memory_space<vmem>>, %arg4: memref<20x20xbf16, #tpu.memory_space<vmem>>, %arg5: memref<20x1xf32, #tpu.memory_space<vmem>>, %arg6: memref<20x1xf32, #tpu.memory_space<vmem>>, %arg7: memref<1x1xf32, #tpu.memory_space<vmem>>, %arg8: memref<1x128xf32, #tpu.memory_space<vmem>>) attributes {dimension_semantics = [#tpu.dimension_semantics<parallel>], iteration_bounds = array<i64: 1>, scalar_prefetch = 0 : i64, scratch_operands = 0 : i64, tpu.core_type = #tpu.core_type<tc>, window_params = [{transform_indices = @transform_0, window_bounds = array<i64: 2, 128>}, {pipeline_mode = #tpu.pipeline_mode<synchronous>, transform_indices = @transform_1, window_bounds = array<i64: 20, 2>}, {pipeline_mode = #tpu.pipeline_mode<synchronous>, transform_indices = @transform_2, window_bounds = array<i64: 20, 1>}, {pipeline_mode = #tpu.pipeline_mode<synchronous>, transform_indices = @transform_3, window_bounds = array<i64: 20, 20>}, {pipeline_mode = #tpu.pipeline_mode<synchronous>, transform_indices = @transform_4, window_bounds = array<i64: 20, 1>}, {pipeline_mode = #tpu.pipeline_mode<synchronous>, transform_indices = @transform_5, window_bounds = array<i64: 20, 1>}, {pipeline_mode = #tpu.pipeline_mode<synchronous>, transform_indices = @transform_6, window_bounds = array<i64: 1, 1>}, {transform_indices = @transform_7, window_bounds = array<i64: 1, 128>}]} {
    %c0 = arith.constant 0 : index
    %c0_0 = arith.constant 0 : index
    %0 = vector.load %arg1[%c0, %c0_0] : memref<2x128xf32, #tpu.memory_space<vmem>>, vector<2x128xf32>
    %c0_1 = arith.constant 0 : index
    %c0_2 = arith.constant 0 : index
    %1 = vector.load %arg2[%c0_1, %c0_2] : memref<20x2xf32, #tpu.memory_space<vmem>>, vector<20x2xf32>
    %2 = vector.extract_strided_slice %1 {offsets = [0, 0], sizes = [20, 1], strides = [1, 1]} : vector<20x2xf32> to vector<20x1xf32>
    %3 = vector.extract_strided_slice %0 {offsets = [0, 0], sizes = [1, 128], strides = [1, 1]} : vector<2x128xf32> to vector<1x128xf32>
    %4 = vector.broadcast %2 : vector<20x1xf32> to vector<20x128xf32>
    %5 = vector.broadcast %3 : vector<1x128xf32> to vector<20x128xf32>
    %6 = arith.mulf %4, %5 : vector<20x128xf32>
    %7 = vector.extract_strided_slice %1 {offsets = [0, 1], sizes = [20, 1], strides = [1, 1]} : vector<20x2xf32> to vector<20x1xf32>
    %8 = vector.extract_strided_slice %0 {offsets = [1, 0], sizes = [1, 128], strides = [1, 1]} : vector<2x128xf32> to vector<1x128xf32>
    %9 = vector.broadcast %7 : vector<20x1xf32> to vector<20x128xf32>
    %10 = vector.broadcast %8 : vector<1x128xf32> to vector<20x128xf32>
    %11 = arith.mulf %9, %10 : vector<20x128xf32>
    %12 = arith.addf %6, %11 : vector<20x128xf32>
    %c0_3 = arith.constant 0 : index
    %c0_4 = arith.constant 0 : index
    %13 = vector.load %arg3[%c0_3, %c0_4] : memref<20x1xf32, #tpu.memory_space<vmem>>, vector<20x1xf32>
    %14 = vector.broadcast %13 : vector<20x1xf32> to vector<20x128xf32>
    %15 = arith.addf %12, %14 : vector<20x128xf32>
    %cst = arith.constant 0.000000e+00 : f32
    %16 = vector.broadcast %cst : f32 to vector<20x128xf32>
    %17 = arith.maximumf %15, %16 : vector<20x128xf32>
    %c0_5 = arith.constant 0 : index
    %c0_6 = arith.constant 0 : index
    %18 = vector.load %arg4[%c0_5, %c0_6] : memref<20x20xbf16, #tpu.memory_space<vmem>>, vector<20x20xbf16>
    %19 = arith.truncf %17 : vector<20x128xf32> to vector<20x128xbf16>
    %cst_7 = arith.constant dense<0.000000e+00> : vector<20x128xf32>
    %20 = tpu.matmul %18, %19, %cst_7 {dimension_numbers = #tpu.dot_dimension_numbers<[1], [0], [0], [1], [0, 0, 1, 1], [], []>} : vector<20x20xbf16>, vector<20x128xbf16>, vector<20x128xf32> -> vector<20x128xf32>
    %c0_8 = arith.constant 0 : index
    %c0_9 = arith.constant 0 : index
    %21 = vector.load %arg5[%c0_8, %c0_9] : memref<20x1xf32, #tpu.memory_space<vmem>>, vector<20x1xf32>
    %22 = vector.broadcast %21 : vector<20x1xf32> to vector<20x128xf32>
    %23 = arith.addf %20, %22 : vector<20x128xf32>
    %cst_10 = arith.constant 0.000000e+00 : f32
    %24 = vector.broadcast %cst_10 : f32 to vector<20x128xf32>
    %25 = arith.maximumf %23, %24 : vector<20x128xf32>
    %c0_11 = arith.constant 0 : index
    %c0_12 = arith.constant 0 : index
    %26 = vector.load %arg6[%c0_11, %c0_12] : memref<20x1xf32, #tpu.memory_space<vmem>>, vector<20x1xf32>
    %27 = vector.broadcast %26 : vector<20x1xf32> to vector<20x128xf32>
    %28 = arith.mulf %27, %25 : vector<20x128xf32>
    %cst_13 = arith.constant dense<0.000000e+00> : vector<128xf32>
    %29 = vector.multi_reduction <add>, %28, %cst_13 [0] : vector<20x128xf32> to vector<128xf32>
    %30 = vector.shape_cast %29 : vector<128xf32> to vector<1x128xf32>
    %c0_14 = arith.constant 0 : index
    %c0_15 = arith.constant 0 : index
    %31 = vector.load %arg7[%c0_14, %c0_15] : memref<1x1xf32, #tpu.memory_space<vmem>>, vector<1x1xf32>
    %32 = vector.broadcast %31 : vector<1x1xf32> to vector<1x128xf32>
    %33 = arith.addf %30, %32 : vector<1x128xf32>
    %c0_16 = arith.constant 0 : index
    %c0_17 = arith.constant 0 : index
    %34 = vector.load %arg8[%c0_16, %c0_17] : memref<1x128xf32, #tpu.memory_space<vmem>>, vector<1x128xf32>
    tpu.vector_store %arg8[%c0_16, %c0_17], %33 {strides = array<i32>} : memref<1x128xf32, #tpu.memory_space<vmem>>, vector<1x128xf32>,
    return
  }
  func.func @transform_0(%arg0: i32) -> (i32, i32) {
    %c0_i32 = arith.constant 0 : i32
    %c0_i32_0 = arith.constant 0 : i32
    return %c0_i32, %arg0 : i32, i32
  }
  func.func @transform_1(%arg0: i32) -> (i32, i32) {
    %c0_i32 = arith.constant 0 : i32
    %c0_i32_0 = arith.constant 0 : i32
    %c0_i32_1 = arith.constant 0 : i32
    return %c0_i32, %c0_i32_0 : i32, i32
  }
  func.func @transform_2(%arg0: i32) -> (i32, i32) {
    %c0_i32 = arith.constant 0 : i32
    %c0_i32_0 = arith.constant 0 : i32
    %c0_i32_1 = arith.constant 0 : i32
    return %c0_i32, %c0_i32_0 : i32, i32
  }
  func.func @transform_3(%arg0: i32) -> (i32, i32) {
    %c0_i32 = arith.constant 0 : i32
    %c0_i32_0 = arith.constant 0 : i32
    %c0_i32_1 = arith.constant 0 : i32
    return %c0_i32, %c0_i32_0 : i32, i32
  }
  func.func @transform_4(%arg0: i32) -> (i32, i32) {
    %c0_i32 = arith.constant 0 : i32
    %c0_i32_0 = arith.constant 0 : i32
    %c0_i32_1 = arith.constant 0 : i32
    return %c0_i32, %c0_i32_0 : i32, i32
  }
  func.func @transform_5(%arg0: i32) -> (i32, i32) {
    %c0_i32 = arith.constant 0 : i32
    %c0_i32_0 = arith.constant 0 : i32
    %c0_i32_1 = arith.constant 0 : i32
    return %c0_i32, %c0_i32_0 : i32, i32
  }
  func.func @transform_6(%arg0: i32) -> (i32, i32) {
    %c0_i32 = arith.constant 0 : i32
    %c0_i32_0 = arith.constant 0 : i32
    %c0_i32_1 = arith.constant 0 : i32
    return %c0_i32, %c0_i32_0 : i32, i32
  }
  func.func @transform_7(%arg0: i32) -> (i32, i32) {
    %c0_i32 = arith.constant 0 : i32
    %c0_i32_0 = arith.constant 0 : i32
    return %c0_i32, %arg0 : i32, i32
  }
}

</mosaic_0001>

<bundles_post_ra>
// kernel: circle_model_v2.1
= control target key start
LH: loop header
LB: loop body
LE: loop exit
PB: predicated region body
PF: predicated region fallthrough
CT: control target
= control target key end

     0   :  { %v222_v0 = vmov 0   ;;  %v223_v6 = vmov 1   ;;  %vm133_vm0 = vcmask 1041408   ;;  %vm126_vm1 = vcmask 162816   ;;  %s315_s2 = inlined_call_operand.vmem [shape: f32[20,1], index: 2, kind: input, shape index: {}]   ;;  %s316_s1 = inlined_call_operand.vmem [shape: f32[20,2], index: 1, kind: input, shape index: {}]   ;;  %s317_s6 = inlined_call_operand.<no memory space> [shape: f32[1,1], index: 6, kind: input, shape index: {}]   ;;  %s318_s5 = inlined_call_operand.vmem [shape: f32[20,1], index: 5, kind: input, shape index: {}]   ;;  %s319_s4 = inlined_call_operand.vmem [shape: f32[20,1], index: 4, kind: input, shape index: {}]   ;;  %s320_s0 = inlined_call_operand.vmem [shape: f32[2,128], index: 0, kind: input, shape index: {}]   ;;  %s321_s3 = inlined_call_operand.vmem [shape: bf16[20,20], index: 3, kind: input, shape index: {}]   ;;  %s322_s7 = inlined_call_operand.vmem [shape: f32[1,128], index: 7, kind: output, shape index: {}]  }
   0x1   :  { %215 = vset.pattern.permute.xlu1 %v222_v0  ;;  %213 = vset.pattern.permute.xlu0 %v222_v0  ;;  %v73_v1 = vld [vmem:[%s315_s2 + $0x10] sm:$0xf]  ;;  %v31_v3 = vld [vmem:[%s316_s1 + $0x8] sm:$0xff]  ;;  %v12_v4 = vstv %s317_s6  ;;  %v30_v5 = vld [vmem:[%s316_s1] sm:$0xff]  ;;  %vm180_vm2 = vcmask 1043456  }
   0x2   :  { %v32_v2 = vld [vmem:[%s316_s1 + $0x10] sm:$0xf]  ;;  %86 = vperm.xlu1 %215, %v73_v1   ;;  %216 = vset.pattern.permute.xlu2 %v222_v0  ;;  %13 = vst [vmem:[#allocation2] sm:$0x1] %v12_v4  ;;  %v72_v7 = vld [vmem:[%s315_s2 + $0x8] sm:$0xff]  ;;  %v71_v8 = vld [vmem:[%s315_s2] sm:$0xff] }
   0x3   :  { %45 = vperm.xlu0 %213, %v32_v2   ;;  %40 = vperm.xlu2 %216, %v31_v3   ;;  %v159_v9 = vld [vmem:[%s318_s5 + $0x8] sm:$0xff]  ;;  %v158_v11 = vld [vmem:[%s318_s5] sm:$0xff]  ;;  %v102_v14 = vld [vmem:[%s319_s4 + $0x10] sm:$0xf] }
   0x4   :  { %v101_v10 = vld [vmem:[%s319_s4 + $0x8] sm:$0xff]  ;;  %v100_v13 = vld [vmem:[%s319_s4] sm:$0xff]  ;;  %v160_v19 = vld [vmem:[%s318_s5 + $0x10] sm:$0xf] }
   0x5   :  { %v29_v18 = vld [vmem:[%s320_s0] sm:$0x3]  ;;  %v97_v41 = vld [vmem:[%s321_s3 + $0x8] sm:$0x3] }
   0x6   :  { %v48_v20 = vperm.slane %v29_v18, 0  ;;  %v64_v21 = vperm.slane %v29_v18, 1  ;;  %v123_v44 = vunpack.c.l.b16 %v97_v41  ;;  %v208_v48 = vld [vmem:[%s321_s3] sm:$0xff] }
   0x8   :  { %v125_v49 = vpack.c.b16 %v123_v44, %v123_v44 }
   0x9   :  { %v189_v12 = vld [vmem:[#allocation2] sm:$0x1] }
   0xa   :  { %35 = vperm.xlu1 %215, %v30_v5  }
   0xb   :  { %214 = vset.pattern.permute.xlu0 %v223_v6  ;;  %217 = vset.pattern.permute.xlu2 %v223_v6 }
   0xc   :  { %61 = vperm.xlu0 %214, %v32_v2   ;;  %53 = vperm.xlu2 %217, %v30_v5  }
  0x12   :  { %218 = vset.pattern.permute.xlu1 %v223_v6 }
  0x13   :  { %57 = vperm.xlu1 %218, %v31_v3  }
  0x14   :  { %220 = vset.pattern.permute.xlu0 %v222_v0  ;;  %219 = vset.pattern.permute.xlu2 %v222_v0 }
  0x15   :  { %81 = vperm.xlu0 %220, %v72_v7   ;;  %76 = vperm.xlu2 %219, %v71_v8  }
  0x1b   :  { %221 = vset.pattern.permute.xlu1 %v222_v0 }
  0x1c   :  { %105 = vperm.xlu1 %221, %v100_v13  }
  0x1d   :  { %168 = vperm.xlu0 %220, %v159_v9   ;;  %110 = vperm.xlu2 %219, %v101_v10  }
  0x24   :  { %115 = vperm.xlu1 %221, %v102_v14  }
  0x25   :  { %163 = vperm.xlu2 %219, %v158_v11  }
  0x2c   :  { %173 = vperm.xlu1 %221, %v160_v19  }
  0x2d   :  { %192 = vperm.xlu2 %219, %v189_v12  }
  0x5d   :  { %v41_v15 = vpop.permute.xlu2 %40 }
  0x5e   :  { %v50_v34 = vmul.f32 %v48_v20, %v41_v15 }
  0x66   :  { %v54_v23 = vpop.permute.xlu2 %53 }
  0x67   :  { %v65_v27 = vmul.f32 %v64_v21, %v54_v23 }
  0x6f   :  { %v77_v37 = vpop.permute.xlu2 %76 }
  0x74   :  { %v87_v16 = vpop.permute.xlu1 %86 }
  0x75   :  { %v46_v17 = vpop.permute.xlu0 %45 }
  0x76   :  { %v51_v25 = vmul.f32 %v48_v20, %v46_v17 }
  0x77   :  { %v111_v54 = vpop.permute.xlu2 %110 }
  0x7c   :  { %v36_v22 = vpop.permute.xlu1 %35 }
  0x7d   :  { %v49_v28 = vmul.f32 %v48_v20, %v36_v22 }
  0x7e   :  { %v62_v24 = vpop.permute.xlu0 %61 }
  0x7f   :  { %v67_v26 = vmul.f32 %v64_v21, %v62_v24  ;;  %v68_v31 = vadd.f32 %v65_v27, %v49_v28  ;;  %v164_v0 = vpop.permute.xlu2 %163 }
  0x81   :  { %v70_v29 = vadd.f32 %v67_v26, %v51_v25  ;;  %v89_v40 = vadd.f32 %v77_v37, %v68_v31 }
  0x83   :  { %v91_v30 = vadd.f32 %v87_v16, %v70_v29  ;;  %v92_v46 = vmax.f32 %v89_v40, 0.0 }
  0x85   :  { %v94_v32 = vmax.f32 %v91_v30, 0.0  ;;  %v58_v33 = vpop.permute.xlu1 %57 }
  0x86   :  { %v66_v35 = vmul.f32 %v64_v21, %v58_v33 }
  0x87   :  { %v99_v36 = vpack.c.bf16 %v94_v32, %v94_v32  ;;  %v82_v42 = vpop.permute.xlu0 %81  ;;  %v193_v12 = vpop.permute.xlu2 %192 }
  0x88   :  { %v69_v38 = vadd.f32 %v66_v35, %v50_v34  ;;  %v195_v14 = vperm.slane %v193_v12, 0 }
  0x89   :  { %v135_v39 = vsel %vm133_vm0, %v99_v36, 0 }
  0x8a   :  { %143 = vmatpush.bf16.msra.mxu0 %v135_v39  ;;  %209 = vmatpush.bf16.msra.mxu1 %v135_v39  ;;  %v90_v43 = vadd.f32 %v82_v42, %v69_v38 }
  0x8c   :  { %v93_v45 = vmax.f32 %v90_v43, 0.0 }
  0x8e   :  { %v98_v47 = vpack.c.bf16 %v93_v45, %v92_v46  ;;  %v106_v50 = vpop.permute.xlu1 %105 }
  0x8f   :  { %v169_v1 = vpop.permute.xlu0 %168 }
  0x90   :  { %144 = vmatpush.bf16.msra.mxu0 %v98_v47  ;;  %210 = vmatpush.bf16.msra.mxu1 %v98_v47 }
  0x93   :  { %206 = vmatmul.msk.bf16.vlgmr.msra.gmra.mxu0 %vm126_vm1, %v208_v48  ;;  %207 = vmatmul.msk.bf16.vlgmr.msra.gmra.mxu1 %vm126_vm1, %v125_v49 }
  0x96   :  { %v116_v53 = vpop.permute.xlu1 %115 }
  0x9e   :  { %v174_v62 = vpop.permute.xlu1 %173 }
 0x110   :  { %v146_v51 = vpop.f32.mrf.mxu0  ;;  %v151_v52 = vpop.f32.mrf.mxu1 }
 0x111   :  { %v152_v55 = vadd.f32 %v151_v52, %v116_v53  ;;  %v147_v56 = vadd.f32 %v146_v51, %v106_v50 }
 0x113   :  { %v157_v57 = vmax.f32 %v152_v55, 0.0  ;;  %v155_v60 = vmax.f32 %v147_v56, 0.0 }
 0x115   :  { %v178_v2 = vmul.f32 %v174_v62, %v157_v57  ;;  %v176_v3 = vmul.f32 %v164_v0, %v155_v60 }
 0x117   :  { %v181_v6 = vsel %vm180_vm2, %v178_v2, 0.0 }
 0x118   :  { %v148_v58 = vpop.f32.mrf.mxu0  ;;  %v153_v59 = vpop.f32.mrf.mxu1 }
 0x119   :  { %v149_v61 = vadd.f32 %v148_v58, %v111_v54 }
 0x11b   :  { %v156_v63 = vmax.f32 %v149_v61, 0.0 }
 0x11d   :  { %v177_v4 = vmul.f32 %v169_v1, %v156_v63 }
 0x11f   :  { %v179_v5 = vadd.f32 %v177_v4, %v176_v3 }
 0x121   :  { %v182_v7 = vadd.f32 %v181_v6, %v179_v5 }
 0x123   :  { %v183_v8 = vrot.slane %v182_v7, 4 }
 0x125   :  { %v184_v9 = vadd.f32 %v183_v8, %v182_v7 }
 0x127   :  { %v185_v10 = vrot.slane %v184_v9, 2 }
 0x129   :  { %v186_v11 = vadd.f32 %v185_v10, %v184_v9 }
 0x12b   :  { %v187_v13 = vrot.slane %v186_v11, 1 }
 0x12d   :  { %v188_v15 = vadd.f32 %v187_v13, %v186_v11 }
 0x12f   :  { %v196_v16 = vadd.f32 %v195_v14, %v188_v15 }
 0x131   :  { %197 = vst [vmem:[%s322_s7] sm:$0x1] %v196_v16 }

</bundles_post_ra>
